<compile_context>
chip_gen: v5e
topology: v5e:2x2
jax: 0.10.0
libtpu: 0.0.40
codegen_flags: <defaults>
</compile_context>

<pallas_src>
import functools

import jax
import jax.numpy as jnp
from jax.experimental import pallas as pl
from jax.experimental.pallas import tpu as pltpu


def _round_up(n, m):
    return (n + m - 1) // m * m


def mlp_kernel(x_ref, w1_ref, b1_ref, w2_ref, b2_ref, w3_ref, b3_ref,
               w4_ref, b4_ref, o_ref):
    # Per-tile cast of x to the MXU dtype (bf16 by default); no HBM copy.
    x = x_ref[...].astype(w1_ref.dtype)

    # Layers 1-3: MXU matmuls with f32 accumulation; bias + ReLU on the VPU in f32.
    y = jnp.dot(x, w1_ref[...], preferred_element_type=jnp.float32)
    y = jnp.maximum(y + b1_ref[...], 0.0)

    y = jnp.dot(y.astype(w2_ref.dtype), w2_ref[...],
                preferred_element_type=jnp.float32)
    y = jnp.maximum(y + b2_ref[...], 0.0)

    y = jnp.dot(y.astype(w3_ref.dtype), w3_ref[...],
                preferred_element_type=jnp.float32)
    y = jnp.maximum(y + b3_ref[...], 0.0)

    # Final layer (out_features == 1): contract w4 (1, H3p) with y (tb, H3p)
    # on their last dims -> (1, tb).  Avoids an N=1 matmul (127/128 output
    # columns wasted) and gives a lane-dense row stored as a full unmasked block.
    row = jax.lax.dot_general(w4_ref[...], y, (((1,), (1,)), ((), ())),
                              preferred_element_type=jnp.float32)
    row = row + b4_ref[0, 0]                     # scalar bias from SMEM
    o_ref[...] = row[None].astype(o_ref.dtype)   # (1, 1, tb) full-block store


def prepare_params(params, mxu_dtype=jnp.bfloat16):
    """Pad weights/biases once, outside the jitted forward.

    params = (w1, b1, w2, b2, w3, b3, w4, b4); wi are (in, out), bi are (1, out).
    w1 keeps its native K (= n_feature) so x never needs lane padding; all
    hidden dims are padded to the 128-lane width.  w4/b4 (out_features = 1)
    become a broadcast row + SMEM scalar.
    """
    w1, b1, w2, b2, w3, b3, w4, b4 = params
    F, H1 = w1.shape
    H2, H3 = w2.shape[1], w3.shape[1]
    H1p, H2p, H3p = (_round_up(h, 128) for h in (H1, H2, H3))

    w1_p = jnp.zeros((F, H1p), mxu_dtype).at[:, :H1].set(w1.astype(mxu_dtype))
    w2_p = jnp.zeros((H1p, H2p), mxu_dtype).at[:H1, :H2].set(w2.astype(mxu_dtype))
    w3_p = jnp.zeros((H2p, H3p), mxu_dtype).at[:H2, :H3].set(w3.astype(mxu_dtype))
    b1_p = jnp.zeros((1, H1p), jnp.float32).at[:, :H1].set(b1.astype(jnp.float32))
    b2_p = jnp.zeros((1, H2p), jnp.float32).at[:, :H2].set(b2.astype(jnp.float32))
    b3_p = jnp.zeros((1, H3p), jnp.float32).at[:, :H3].set(b3.astype(jnp.float32))
    w4_row = jnp.zeros((1, H3p), jnp.float32).at[0, :H3].set(w4[:, 0].astype(jnp.float32))
    b4_p = b4.reshape(1, 1).astype(jnp.float32)
    return (w1_p, b1_p, w2_p, b2_p, w3_p, b3_p, w4_row, b4_p)


@functools.partial(jax.jit, static_argnames=("tb",))
def rnn_forward(x, prepared, *, tb=2048):
    """x: (B, n_feature) float32; prepared = prepare_params(params)."""
    w1_p, b1_p, w2_p, b2_p, w3_p, b3_p, w4_row, b4_p = prepared
    B, F = x.shape
    assert w1_p.shape[0] == F, "feature dim mismatch"
    H1p, H2p, H3p = w1_p.shape[1], w2_p.shape[1], w3_p.shape[1]

    # Batch tile: large, 128-aligned, never wider than the rounded batch.
    tb = max(128, _round_up(tb, 128))
    rounded_B = _round_up(B, 128)
    tb = min(tb, rounded_B)
    # v7x megacore: keep >= 2 parallel grid steps when the batch allows it.
    if rounded_B >= 256:
        tb = min(tb, _round_up((rounded_B + 1) // 2, 128))
    num_tiles = pl.cdiv(B, tb)
    B_pad = num_tiles * tb
    # NOTE: x is NOT padded.  The last batch block may read out-of-bounds rows
    # (Pallas pads edge blocks with unspecified values); those rows only affect
    # their own (discarded) outputs, because every layer is row-independent.

    weight_spec = lambda arr: pl.BlockSpec(arr.shape, lambda i: (0, 0))
    in_specs = [
        pl.BlockSpec((tb, F), lambda i: (i, 0)),     # x: native feature width
        weight_spec(w1_p), weight_spec(b1_p),
        weight_spec(w2_p), weight_spec(b2_p),
        weight_spec(w3_p), weight_spec(b3_p),
        weight_spec(w4_row),
        pl.BlockSpec(memory_space=pltpu.MemorySpace.SMEM),   # b4 scalar
    ]

    # Advisory cost estimate (effective work, dominated by HBM bytes for x).
    param_bytes = sum(int(a.size) * a.dtype.itemsize
                      for a in (w1_p, b1_p, w2_p, b2_p, w3_p, b3_p, w4_row, b4_p))
    flops = 2 * B_pad * (F * H1p + H1p * H2p + H2p * H3p + H3p)
    bytes_accessed = int(B * F * x.dtype.itemsize + param_bytes + B_pad * 4)
    cost = pl.CostEstimate(flops=int(flops), transcendentals=0,
                           bytes_accessed=bytes_accessed)

    # VMEM budget: double-buffered x tile + resident weights + f32 intermediates.
    vmem_est = (2 * tb * F * x.dtype.itemsize
                + 2 * param_bytes
                + 8 * tb * 128 * 4
                + 2 * tb * 4)
    vmem_limit = int(min(max(vmem_est, 32 << 20), 64 << 20))

    out_tiles = pl.pallas_call(
        mlp_kernel,
        out_shape=jax.ShapeDtypeStruct((num_tiles, 1, tb), jnp.float32),
        grid_spec=pltpu.PrefetchScalarGridSpec(
            num_scalar_prefetch=0,
            grid=(num_tiles,),
            in_specs=in_specs,
            # Lane-dense output block: (1, 1, tb) -- full / unmasked stores.
            out_specs=pl.BlockSpec((1, 1, tb), lambda i: (i, 0, 0)),
        ),
        compiler_params=pltpu.CompilerParams(
            dimension_semantics=("parallel",),
            vmem_limit_bytes=vmem_limit),
        cost_estimate=cost,
    )(x, w1_p, b1_p, w2_p, b2_p, w3_p, b3_p, w4_row, b4_p)

    # (num_tiles, 1, tb) lane-dense layout -> (B, 1); garbage tail rows dropped.
    return out_tiles.reshape(B_pad)[:B, None]


def init_params(key, n_feature, n_l1, n_l2, n_l3):
    """Deterministic init mimicking nn.Linear shapes (stored transposed)."""
    dims = [(n_feature, n_l1), (n_l1, n_l2), (n_l2, n_l3), (n_l3, 1)]
    params = []
    for idx, (fan_in, fan_out) in enumerate(dims):
        kw, kb = jax.random.split(jax.random.fold_in(key, idx))
        bound = 1.0 / jnp.sqrt(fan_in)
        w = jax.random.uniform(kw, (fan_in, fan_out), jnp.float32, -bound, bound)
        b = jax.random.uniform(kb, (1, fan_out), jnp.float32, -bound, bound)
        params += [w, b]
    return tuple(params)


def reference_forward(x, params, cast_dtype=None):
    """Pure-JAX reference.  cast_dtype mimics the kernel's MXU input rounding."""
    w1, b1, w2, b2, w3, b3, w4, b4 = params
    if cast_dtype is not None:
        c = lambda a: a.astype(cast_dtype).astype(jnp.float32)
    else:
        c = lambda a: a
    y = jnp.maximum(c(x) @ c(w1) + b1, 0.0)
    y = jnp.maximum(c(y) @ c(w2) + b2, 0.0)
    y = jnp.maximum(c(y) @ c(w3) + b3, 0.0)
    return y @ w4 + b4


if __name__ == "__main__":
    key = jax.random.PRNGKey(0)
    n_feature, n_l1, n_l2, n_l3 = 67, 32, 32, 16

    kx, kx2, kp = jax.random.split(key, 3)
    params = init_params(kp, n_feature, n_l1, n_l2, n_l3)
    prep_bf16 = prepare_params(params, mxu_dtype=jnp.bfloat16)   # default path
    prep_f32 = prepare_params(params, mxu_dtype=jnp.float32)     # strict path

    # 1) Small batch, f32 MXU path, single (partial) grid step -- tight tolerance.
    B = 16
    x = jax.random.normal(kx, (B, n_feature), jnp.float32)
    out = rnn_forward(x, prep_f32)
    jax.block_until_ready(out)
    ref = reference_forward(x, params)
    assert out.shape == (B, 1)
    err = jnp.max(jnp.abs(out - ref))
    assert jnp.allclose(out, ref, atol=1e-4, rtol=1e-4), float(err)

    # 2) Ragged batch, bf16 default path, default tb (exercises the megacore
    #    >=2-tile cap and the partial edge block) -- compare vs bf16-rounded ref.
    B2 = 300
    x2 = jax.random.normal(kx2, (B2, n_feature), jnp.float32)
    out2 = rnn_forward(x2, prep_bf16)
    jax.block_until_ready(out2)
    ref2 = reference_forward(x2, params, cast_dtype=jnp.bfloat16)
    assert out2.shape == (B2, 1)
    err2 = jnp.max(jnp.abs(out2 - ref2))
    assert jnp.allclose(out2, ref2, atol=1e-2, rtol=1e-2), float(err2)

    # 3) Same ragged batch with a small explicit tile (3-step parallel grid).
    out3 = rnn_forward(x2, prep_bf16, tb=128)
    jax.block_until_ready(out3)
    err3 = jnp.max(jnp.abs(out3 - ref2))
    assert out3.shape == (B2, 1)
    assert jnp.allclose(out3, ref2, atol=1e-2, rtol=1e-2), float(err3)

    print("KERNEL_OK")
</pallas_src>

<mosaic_0001>
module attributes {stable_mosaic.version = 11 : i64} {
  func.func @mlp_kernel(%arg0: i32, %arg1: memref<128x67xf32, #tpu.memory_space<vmem>>, %arg2: memref<67x128xf32, #tpu.memory_space<vmem>>, %arg3: memref<1x128xf32, #tpu.memory_space<vmem>>, %arg4: memref<128x128xf32, #tpu.memory_space<vmem>>, %arg5: memref<1x128xf32, #tpu.memory_space<vmem>>, %arg6: memref<128x128xf32, #tpu.memory_space<vmem>>, %arg7: memref<1x128xf32, #tpu.memory_space<vmem>>, %arg8: memref<1x128xf32, #tpu.memory_space<vmem>>, %arg9: memref<1x1xf32, #tpu.memory_space<smem>>, %arg10: memref<1x1x128xf32, #tpu.memory_space<vmem>>) attributes {dimension_semantics = [#tpu.dimension_semantics<parallel>], iteration_bounds = array<i64: 1>, scalar_prefetch = 0 : i64, scratch_operands = 0 : i64, tpu.core_type = #tpu.core_type<tc>, window_params = [{transform_indices = @transform_0, window_bounds = array<i64: 128, 67>}, {pipeline_mode = #tpu.pipeline_mode<synchronous>, transform_indices = @transform_1, window_bounds = array<i64: 67, 128>}, {pipeline_mode = #tpu.pipeline_mode<synchronous>, transform_indices = @transform_2, window_bounds = array<i64: 1, 128>}, {pipeline_mode = #tpu.pipeline_mode<synchronous>, transform_indices = @transform_3, window_bounds = array<i64: 128, 128>}, {pipeline_mode = #tpu.pipeline_mode<synchronous>, transform_indices = @transform_4, window_bounds = array<i64: 1, 128>}, {pipeline_mode = #tpu.pipeline_mode<synchronous>, transform_indices = @transform_5, window_bounds = array<i64: 128, 128>}, {pipeline_mode = #tpu.pipeline_mode<synchronous>, transform_indices = @transform_6, window_bounds = array<i64: 1, 128>}, {pipeline_mode = #tpu.pipeline_mode<synchronous>, transform_indices = @transform_7, window_bounds = array<i64: 1, 128>}, {transform_indices = @transform_8, window_bounds = array<i64: 1, 1>}, {transform_indices = @transform_9, window_bounds = array<i64: 1, 1, 128>}]} {
    %c0 = arith.constant 0 : index
    %c0_0 = arith.constant 0 : index
    %0 = vector.load %arg1[%c0, %c0_0] : memref<128x67xf32, #tpu.memory_space<vmem>>, vector<128x67xf32>
    %c0_1 = arith.constant 0 : index
    %c0_2 = arith.constant 0 : index
    %1 = vector.load %arg2[%c0_1, %c0_2] : memref<67x128xf32, #tpu.memory_space<vmem>>, vector<67x128xf32>
    %cst = arith.constant dense<0.000000e+00> : vector<128x128xf32>
    %2 = tpu.matmul %0, %1, %cst {dimension_numbers = #tpu.dot_dimension_numbers<[1], [0], [0], [1], [0, 0, 1, 1], [], []>} : vector<128x67xf32>, vector<67x128xf32>, vector<128x128xf32> -> vector<128x128xf32>
    %c0_3 = arith.constant 0 : index
    %c0_4 = arith.constant 0 : index
    %3 = vector.load %arg3[%c0_3, %c0_4] : memref<1x128xf32, #tpu.memory_space<vmem>>, vector<1x128xf32>
    %4 = vector.broadcast %3 : vector<1x128xf32> to vector<128x128xf32>
    %5 = arith.addf %2, %4 : vector<128x128xf32>
    %cst_5 = arith.constant 0.000000e+00 : f32
    %6 = vector.broadcast %cst_5 : f32 to vector<128x128xf32>
    %7 = arith.maximumf %5, %6 : vector<128x128xf32>
    %c0_6 = arith.constant 0 : index
    %c0_7 = arith.constant 0 : index
    %8 = vector.load %arg4[%c0_6, %c0_7] : memref<128x128xf32, #tpu.memory_space<vmem>>, vector<128x128xf32>
    %cst_8 = arith.constant dense<0.000000e+00> : vector<128x128xf32>
    %9 = tpu.matmul %7, %8, %cst_8 {dimension_numbers = #tpu.dot_dimension_numbers<[1], [0], [0], [1], [0, 0, 1, 1], [], []>} : vector<128x128xf32>, vector<128x128xf32>, vector<128x128xf32> -> vector<128x128xf32>
    %c0_9 = arith.constant 0 : index
    %c0_10 = arith.constant 0 : index
    %10 = vector.load %arg5[%c0_9, %c0_10] : memref<1x128xf32, #tpu.memory_space<vmem>>, vector<1x128xf32>
    %11 = vector.broadcast %10 : vector<1x128xf32> to vector<128x128xf32>
    %12 = arith.addf %9, %11 : vector<128x128xf32>
    %cst_11 = arith.constant 0.000000e+00 : f32
    %13 = vector.broadcast %cst_11 : f32 to vector<128x128xf32>
    %14 = arith.maximumf %12, %13 : vector<128x128xf32>
    %c0_12 = arith.constant 0 : index
    %c0_13 = arith.constant 0 : index
    %15 = vector.load %arg6[%c0_12, %c0_13] : memref<128x128xf32, #tpu.memory_space<vmem>>, vector<128x128xf32>
    %cst_14 = arith.constant dense<0.000000e+00> : vector<128x128xf32>
    %16 = tpu.matmul %14, %15, %cst_14 {dimension_numbers = #tpu.dot_dimension_numbers<[1], [0], [0], [1], [0, 0, 1, 1], [], []>} : vector<128x128xf32>, vector<128x128xf32>, vector<128x128xf32> -> vector<128x128xf32>
    %c0_15 = arith.constant 0 : index
    %c0_16 = arith.constant 0 : index
    %17 = vector.load %arg7[%c0_15, %c0_16] : memref<1x128xf32, #tpu.memory_space<vmem>>, vector<1x128xf32>
    %18 = vector.broadcast %17 : vector<1x128xf32> to vector<128x128xf32>
    %19 = arith.addf %16, %18 : vector<128x128xf32>
    %cst_17 = arith.constant 0.000000e+00 : f32
    %20 = vector.broadcast %cst_17 : f32 to vector<128x128xf32>
    %21 = arith.maximumf %19, %20 : vector<128x128xf32>
    %c0_18 = arith.constant 0 : index
    %c0_19 = arith.constant 0 : index
    %22 = vector.load %arg8[%c0_18, %c0_19] : memref<1x128xf32, #tpu.memory_space<vmem>>, vector<1x128xf32>
    %cst_20 = arith.constant dense<0.000000e+00> : vector<1x128xf32>
    %23 = tpu.matmul %22, %21, %cst_20 {dimension_numbers = #tpu.dot_dimension_numbers<[1], [1], [0], [0], [0, 0, 1, 0], [], []>} : vector<1x128xf32>, vector<128x128xf32>, vector<1x128xf32> -> vector<1x128xf32>
    %c0_21 = arith.constant 0 : index
    %c0_22 = arith.constant 0 : index
    %24 = memref.load %arg9[%c0_21, %c0_22] : memref<1x1xf32, #tpu.memory_space<smem>>
    %25 = vector.broadcast %24 : f32 to vector<1x128xf32>
    %26 = arith.addf %23, %25 : vector<1x128xf32>
    %27 = vector.shape_cast %26 : vector<1x128xf32> to vector<1x1x128xf32>
    %c0_23 = arith.constant 0 : index
    %c0_24 = arith.constant 0 : index
    %c0_25 = arith.constant 0 : index
    %28 = vector.load %arg10[%c0_23, %c0_24, %c0_25] : memref<1x1x128xf32, #tpu.memory_space<vmem>>, vector<1x1x128xf32>
    tpu.vector_store %arg10[%c0_23, %c0_24, %c0_25], %27 {strides = array<i32>} : memref<1x1x128xf32, #tpu.memory_space<vmem>>, vector<1x1x128xf32>,
    return
  }
  func.func @transform_0(%arg0: i32) -> (i32, i32) {
    %c0_i32 = arith.constant 0 : i32
    %c0_i32_0 = arith.constant 0 : i32
    return %arg0, %c0_i32 : i32, i32
  }
  func.func @transform_1(%arg0: i32) -> (i32, i32) {
    %c0_i32 = arith.constant 0 : i32
    %c0_i32_0 = arith.constant 0 : i32
    %c0_i32_1 = arith.constant 0 : i32
    return %c0_i32, %c0_i32_0 : i32, i32
  }
  func.func @transform_2(%arg0: i32) -> (i32, i32) {
    %c0_i32 = arith.constant 0 : i32
    %c0_i32_0 = arith.constant 0 : i32
    %c0_i32_1 = arith.constant 0 : i32
    return %c0_i32, %c0_i32_0 : i32, i32
  }
  func.func @transform_3(%arg0: i32) -> (i32, i32) {
    %c0_i32 = arith.constant 0 : i32
    %c0_i32_0 = arith.constant 0 : i32
    %c0_i32_1 = arith.constant 0 : i32
    return %c0_i32, %c0_i32_0 : i32, i32
  }
  func.func @transform_4(%arg0: i32) -> (i32, i32) {
    %c0_i32 = arith.constant 0 : i32
    %c0_i32_0 = arith.constant 0 : i32
    %c0_i32_1 = arith.constant 0 : i32
    return %c0_i32, %c0_i32_0 : i32, i32
  }
  func.func @transform_5(%arg0: i32) -> (i32, i32) {
    %c0_i32 = arith.constant 0 : i32
    %c0_i32_0 = arith.constant 0 : i32
    %c0_i32_1 = arith.constant 0 : i32
    return %c0_i32, %c0_i32_0 : i32, i32
  }
  func.func @transform_6(%arg0: i32) -> (i32, i32) {
    %c0_i32 = arith.constant 0 : i32
    %c0_i32_0 = arith.constant 0 : i32
    %c0_i32_1 = arith.constant 0 : i32
    return %c0_i32, %c0_i32_0 : i32, i32
  }
  func.func @transform_7(%arg0: i32) -> (i32, i32) {
    %c0_i32 = arith.constant 0 : i32
    %c0_i32_0 = arith.constant 0 : i32
    %c0_i32_1 = arith.constant 0 : i32
    return %c0_i32, %c0_i32_0 : i32, i32
  }
  func.func @transform_8(%arg0: i32) -> (i32, i32) {
    %c0_i32 = arith.constant 0 : i32
    %c0_i32_0 = arith.constant 0 : i32
    %c0_i32_1 = arith.constant 0 : i32
    return %c0_i32, %c0_i32_0 : i32, i32
  }
  func.func @transform_9(%arg0: i32) -> (i32, i32, i32) {
    %c0_i32 = arith.constant 0 : i32
    %c0_i32_0 = arith.constant 0 : i32
    %c0_i32_1 = arith.constant 0 : i32
    return %arg0, %c0_i32, %c0_i32_0 : i32, i32, i32
  }
}

</mosaic_0001>

<bundles_post_ra>
// kernel: rnn_forward.1
= control target key start
LH: loop header
LB: loop body
LE: loop exit
PB: predicated region body
PF: predicated region fallthrough
CT: control target
= control target key end

     0   :  { %15 = vsyncpa [#allocation4], 0  ;;  %s740_s0 = inlined_call_operand.hbm [shape: f32[16,67], index: 0, kind: input, shape index: {}]   ;;  %s741_s1 = inlined_call_operand.hbm [shape: f32[67,128], index: 1, kind: input, shape index: {}]   ;;  %s742_s2 = inlined_call_operand.vmem [shape: f32[1,128], index: 2, kind: input, shape index: {}]   ;;  %s743_s3 = inlined_call_operand.hbm [shape: f32[128,128], index: 3, kind: input, shape index: {}]   ;;  %s744_s4 = inlined_call_operand.vmem [shape: f32[1,128], index: 4, kind: input, shape index: {}]   ;;  %s745_s5 = inlined_call_operand.hbm [shape: f32[128,128], index: 5, kind: input, shape index: {}]   ;;  %s746_s6 = inlined_call_operand.vmem [shape: f32[1,128], index: 6, kind: input, shape index: {}]   ;;  %s747_s7 = inlined_call_operand.vmem [shape: f32[1,128], index: 7, kind: input, shape index: {}]   ;;  %s748_s8 = inlined_call_operand.<no memory space> [shape: f32[1,1], index: 8, kind: input, shape index: {}]   ;;  %s749_s9 = inlined_call_operand.vmem [shape: f32[1,1,128], index: 9, kind: output, shape index: {}]  }
   0x1   :  { %16 = vsyncpa [#allocation6], 0 }
   0x2   :  { %17 = vsyncpa [#allocation9], 0 }
   0x3   :  { %21 = vsyncadd [#allocation4], 1792  ;;  %s35_s11 = sshll.u32 %s741_s1, 4  ;;  %s620_s12 = smov [#allocation5]   ;;  %s36_s11 = int_to_ptr.hbm [resolvable:$true] %s35_s11 }
   0x4   :  { %s37_s13 = sshll.u32 %s620_s12, 4  ;;  %s22_s16 = sshll.u32 %s740_s0, 4  ;;  %s38_s13 = int_to_ptr.vmem [resolvable:$true] %s37_s13  ;;  %s23_s16 = int_to_ptr.hbm [resolvable:$true] %s22_s16 }
   0x5   :  { %s621_s17 = smov 128   ;;  %s622_s18 = smov 8  }
   0x6   :  { %43 = dma.hbm_to_vmem [thread:$0]  %s36_s11, 1152, %s38_s13, [#allocation6], %s621_s17, %s621_s17, %s622_s18  }
   0x7   :  { %s623_s19 = smov [#allocation3]   ;;  %s50_s23 = sshll.u32 %s743_s3, 4  ;;  %s51_s23 = int_to_ptr.hbm [resolvable:$true] %s50_s23 }
   0x8   :  { %s24_s20 = sshll.u32 %s623_s19, 4  ;;  %s65_s25 = sshll.u32 %s745_s5, 4  ;;  %s25_s20 = int_to_ptr.vmem [resolvable:$true] %s24_s20  ;;  %s66_s25 = int_to_ptr.hbm [resolvable:$true] %s65_s25 }
   0x9   :  { %30 = dma.hbm_to_vmem [thread:$0]  %s23_s16, 256, %s25_s20, [#allocation4], %s621_s17, %s621_s17, %s622_s18  }
   0xa   :  { %s624_s26 = smov [#allocation7]   ;;  %s625_s0 = smov [#allocation8]  }
   0xb   :  { %s52_s27 = sshll.u32 %s624_s26, 4  ;;  %s67_s28 = sshll.u32 %s625_s0, 4  ;;  %s53_s27 = int_to_ptr.vmem [resolvable:$true] %s52_s27  ;;  %s68_s28 = int_to_ptr.vmem [resolvable:$true] %s67_s28 }
   0xc   :  { %58 = dma.hbm_to_vmem [thread:$0]  %s51_s23, 2048, %s53_s27, [#allocation6], %s621_s17, %s621_s17, %s622_s18  }
   0xd   :  { %73 = dma.hbm_to_vmem [thread:$0]  %s66_s25, 2048, %s68_s28, [#allocation9], %s621_s17, %s621_s17, %s622_s18  }
   0xe   :  { %614 = dma.done.wait [#allocation4], 2048  }
   0xf   :  { %615 = vsyncadd [#allocation4], 4294965248 }
  0x10   :  { %616 = dma.done.wait [#allocation6], 3200  }
  0x11   :  { %617 = vsyncadd [#allocation6], 4294964096 }
  0x12   :  { %618 = dma.done.wait [#allocation9], 2048  }
  0x13   :  { %619 = vsyncadd [#allocation9], 4294965248  ;;  %vm174_vm0 = vcmask 1042432   ;;  %v120_v0 = vld [vmem:[#allocation5 + $0x40] sm:$0x7]  ;;  %v119_v1 = vld [vmem:[#allocation5 + $0x38] sm:$0xff] }
  0x14   :  { %492 = vmatpush.msk.msra.mxu0 %vm174_vm0, %v120_v0  ;;  %v118_v2 = vld [vmem:[#allocation5 + $0x30] sm:$0xff]  ;;  %v117_v3 = vld [vmem:[#allocation5 + $0x28] sm:$0xff]  ;;  %v116_v4 = vld [vmem:[#allocation5 + $0x20] sm:$0xff]  ;;  %vm125_vm1 = vcmask 547840  }
  0x15   :  { %v115_v5 = vld [vmem:[#allocation5 + $0x18] sm:$0xff]  ;;  %v114_v6 = vld [vmem:[#allocation5 + $0x10] sm:$0xff]  ;;  %v113_v7 = vld [vmem:[#allocation5 + $0x8] sm:$0xff] }
  0x16   :  { %186 = vmatpush.msra.mxu0 %v119_v1  ;;  %v112_v8 = vld [vmem:[#allocation5] sm:$0xff]  ;;  %v97_v10 = vld [vmem:[#allocation3 + $0x8] sm:$0xff]  ;;  %v98_v11 = vld [vmem:[#allocation3 + $0x10] sm:$0xff] }
  0x17   :  { %v96_v9 = vld [vmem:[#allocation3] sm:$0xff]  ;;  %v99_v12 = vld [vmem:[#allocation3 + $0x18] sm:$0xff]  ;;  %v101_v14 = vld [vmem:[#allocation3 + $0x28] sm:$0xff] }
  0x18   :  { %187 = vmatpush.msra.mxu0 %v118_v2  ;;  %v100_v13 = vld [vmem:[#allocation3 + $0x20] sm:$0xff]  ;;  %v102_v15 = vld [vmem:[#allocation3 + $0x30] sm:$0xff]  ;;  %v103_v16 = vld [vmem:[#allocation3 + $0x38] sm:$0xff] }
  0x19   :  { %v104_v17 = vld [vmem:[#allocation3 + $0x40] sm:$0xff]  ;;  %v273_v19 = vld [vmem:[#allocation7 + $0x70] sm:$0xff]  ;;  %v272_v20 = vld [vmem:[#allocation7 + $0x68] sm:$0xff] }
  0x1a   :  { %188 = vmatpush.msra.mxu0 %v117_v3  ;;  %v274_v18 = vld [vmem:[#allocation7 + $0x78] sm:$0xff]  ;;  %v105_v21 = vld [vmem:[#allocation3 + $0x48] sm:$0xff]  ;;  %v269_v24 = vld [vmem:[#allocation7 + $0x50] sm:$0xff] }
  0x1b   :  { %279 = vmatpush.msra.mxu1 %v274_v18  ;;  %v271_v22 = vld [vmem:[#allocation7 + $0x60] sm:$0xff]  ;;  %v270_v23 = vld [vmem:[#allocation7 + $0x58] sm:$0xff]  ;;  %v268_v25 = vld [vmem:[#allocation7 + $0x48] sm:$0xff] }
  0x1c   :  { %189 = vmatpush.msra.mxu0 %v116_v4  ;;  %v106_v26 = vld [vmem:[#allocation3 + $0x50] sm:$0xff]  ;;  %v267_v27 = vld [vmem:[#allocation7 + $0x40] sm:$0xff]  ;;  %v266_v28 = vld [vmem:[#allocation7 + $0x38] sm:$0xff] }
  0x1d   :  { %280 = vmatpush.msra.mxu1 %v273_v19  ;;  %v265_v29 = vld [vmem:[#allocation7 + $0x30] sm:$0xff]  ;;  %v264_v30 = vld [vmem:[#allocation7 + $0x28] sm:$0xff]  ;;  %v263_v32 = vld [vmem:[#allocation7 + $0x20] sm:$0xff] }
  0x1e   :  { %190 = vmatpush.msra.mxu0 %v115_v5  ;;  %v107_v31 = vld [vmem:[#allocation3 + $0x58] sm:$0xff]  ;;  %v262_v33 = vld [vmem:[#allocation7 + $0x18] sm:$0xff]  ;;  %v260_v36 = vld [vmem:[#allocation7 + $0x8] sm:$0xff] }
  0x1f   :  { %281 = vmatpush.msra.mxu1 %v272_v20  ;;  %v261_v34 = vld [vmem:[#allocation7 + $0x10] sm:$0xff]  ;;  %v108_v35 = vld [vmem:[#allocation3 + $0x60] sm:$0xff]  ;;  %v259_v37 = vld [vmem:[#allocation7] sm:$0xff] }
  0x20   :  { %191 = vmatpush.msra.mxu0 %v114_v6  ;;  %v109_v38 = vld [vmem:[#allocation3 + $0x68] sm:$0xff]  ;;  %v110_v39 = vld [vmem:[#allocation3 + $0x70] sm:$0xff]  ;;  %v111_v40 = vld [vmem:[#allocation3 + $0x78] sm:$0xff] }
  0x21   :  { %282 = vmatpush.msra.mxu1 %v271_v22  ;;  %v707_v41 = vld [vmem:[%s742_s2] ss:$0 sm:$0xff]  ;;  %v368_v18 = vld [vmem:[#allocation8 + $0x40] sm:$0xff]  ;;  %v366_v22 = vld [vmem:[#allocation8 + $0x30] sm:$0xff] }
  0x22   :  { %192 = vmatpush.msra.mxu0 %v113_v7  ;;  %v375_v5 = vld [vmem:[#allocation8 + $0x78] sm:$0xff] }
  0x23   :  { %283 = vmatpush.msra.mxu1 %v270_v23  ;;  %380 = vmatpush.msra.mxu2 %v375_v5  ;;  %v367_v19 = vld [vmem:[#allocation8 + $0x38] sm:$0xff] }
  0x24   :  { %193 = vmatpush.msra.mxu0 %v112_v8  ;;  %v374_v8 = vld [vmem:[#allocation8 + $0x70] sm:$0xff] }
  0x25   :  { %493 = vmatmul.msk.f32.vlgmr.msra.gmra.mxu0 %vm125_vm1, %v96_v9  ;;  %284 = vmatpush.msra.mxu1 %v269_v24  ;;  %v365_v24 = vld [vmem:[#allocation8 + $0x28] sm:$0xff] }
  0x26   :  { %381 = vmatpush.msra.mxu2 %v374_v8 }
  0x27   :  { %285 = vmatpush.msra.mxu1 %v268_v25  ;;  %v364_v25 = vld [vmem:[#allocation8 + $0x20] sm:$0xff] }
  0x29   :  { %286 = vmatpush.msra.mxu1 %v267_v27 }
  0x2b   :  { %287 = vmatpush.msra.mxu1 %v266_v28 }
  0x2d   :  { %494 = vmatmul.msk.f32.gmra.mxu0 %vm125_vm1, %v97_v10  ;;  %288 = vmatpush.msra.mxu1 %v265_v29  ;;  %v373_v10 = vld [vmem:[#allocation8 + $0x68] sm:$0xff]  ;;  %v362_v29 = vld [vmem:[#allocation8 + $0x10] sm:$0xff] }
  0x2e   :  { %382 = vmatpush.msra.mxu2 %v373_v10 }
  0x2f   :  { %289 = vmatpush.msra.mxu1 %v264_v30 }
  0x31   :  { %290 = vmatpush.msra.mxu1 %v263_v32  ;;  %v360_v32 = vld [vmem:[#allocation8] sm:$0xff] }
  0x33   :  { %291 = vmatpush.msra.mxu1 %v262_v33 }
  0x35   :  { %495 = vmatmul.msk.f32.gmra.mxu0 %vm125_vm1, %v98_v11  ;;  %292 = vmatpush.msra.mxu1 %v261_v34  ;;  %v372_v11 = vld [vmem:[#allocation8 + $0x60] sm:$0xff] }
  0x36   :  { %383 = vmatpush.msra.mxu2 %v372_v11 }
  0x37   :  { %293 = vmatpush.msra.mxu1 %v260_v36 }
  0x39   :  { %294 = vmatpush.msra.mxu1 %v259_v37 }
  0x3d   :  { %496 = vmatmul.msk.f32.gmra.mxu0 %vm125_vm1, %v99_v12  ;;  %v371_v12 = vld [vmem:[#allocation8 + $0x58] sm:$0xff] }
  0x3e   :  { %384 = vmatpush.msra.mxu2 %v371_v12 }
  0x45   :  { %497 = vmatmul.msk.f32.gmra.mxu0 %vm125_vm1, %v100_v13 }
  0x4d   :  { %498 = vmatmul.msk.f32.gmra.mxu0 %vm125_vm1, %v101_v14 }
  0x55   :  { %499 = vmatmul.msk.f32.gmra.mxu0 %vm125_vm1, %v102_v15  ;;  %v370_v15 = vld [vmem:[#allocation8 + $0x50] sm:$0xff] }
  0x56   :  { %385 = vmatpush.msra.mxu2 %v370_v15 }
  0x5d   :  { %500 = vmatmul.msk.f32.gmra.mxu0 %vm125_vm1, %v103_v16 }
  0x65   :  { %501 = vmatmul.msk.f32.gmra.mxu0 %vm125_vm1, %v104_v17  ;;  %v369_v17 = vld [vmem:[#allocation8 + $0x48] sm:$0xff] }
  0x66   :  { %386 = vmatpush.msra.mxu2 %v369_v17 }
  0x68   :  { %387 = vmatpush.msra.mxu2 %v368_v18 }
  0x6a   :  { %388 = vmatpush.msra.mxu2 %v367_v19 }
  0x6c   :  { %389 = vmatpush.msra.mxu2 %v366_v22 }
  0x6d   :  { %502 = vmatmul.msk.f32.gmra.mxu0 %vm125_vm1, %v105_v21 }
  0x6e   :  { %390 = vmatpush.msra.mxu2 %v365_v24 }
  0x70   :  { %391 = vmatpush.msra.mxu2 %v364_v25 }
  0x75   :  { %503 = vmatmul.msk.f32.gmra.mxu0 %vm125_vm1, %v106_v26  ;;  %v363_v26 = vld [vmem:[#allocation8 + $0x18] sm:$0xff] }
  0x76   :  { %392 = vmatpush.msra.mxu2 %v363_v26 }
  0x78   :  { %393 = vmatpush.msra.mxu2 %v362_v29 }
  0x7d   :  { %504 = vmatmul.msk.f32.gmra.mxu0 %vm125_vm1, %v107_v31  ;;  %v361_v31 = vld [vmem:[#allocation8 + $0x8] sm:$0xff] }
  0x7e   :  { %394 = vmatpush.msra.mxu2 %v361_v31 }
  0x80   :  { %395 = vmatpush.msra.mxu2 %v360_v32 }
  0x85   :  { %505 = vmatmul.msk.f32.gmra.mxu0 %vm125_vm1, %v108_v35 }
  0x8d   :  { %506 = vmatmul.msk.f32.gmra.mxu0 %vm125_vm1, %v109_v38 }
  0x95   :  { %507 = vmatmul.msk.f32.gmra.mxu0 %vm125_vm1, %v110_v39 }
  0x9d   :  { %508 = vmatmul.msk.f32.gmra.mxu0 %vm125_vm1, %v111_v40 }
  0xa2   :  { %v195_v42 = vpop.f32.mrf.mxu0 }
  0xa3   :  { %v196_v43 = vadd.f32 %v707_v41, %v195_v42 }
  0xa5   :  { %v243_v44 = vmax.f32 %v196_v43, 0.0  ;;  %v516_v43 = vld [vmem:[%s744_s4] ss:$0 sm:$0xff] }
  0xa7   :  { %295 = vmatmul.f32.vlgmr.msra.gmra.mxu1 %v243_v44 }
  0xaa   :  { %v198_v45 = vpop.f32.mrf.mxu0 }
  0xab   :  { %v199_v46 = vadd.f32 %v707_v41, %v198_v45 }
  0xad   :  { %v244_v47 = vmax.f32 %v199_v46, 0.0 }
  0xaf   :  { %298 = vmatmul.f32.gmra.mxu1 %v244_v47 }
  0xb2   :  { %v201_v48 = vpop.f32.mrf.mxu0 }
  0xb3   :  { %v202_v49 = vadd.f32 %v707_v41, %v201_v48 }
  0xb5   :  { %v245_v50 = vmax.f32 %v202_v49, 0.0 }
  0xb7   :  { %301 = vmatmul.f32.gmra.mxu1 %v245_v50 }
  0xba   :  { %v204_v51 = vpop.f32.mrf.mxu0 }
  0xbb   :  { %v205_v52 = vadd.f32 %v707_v41, %v204_v51 }
  0xbd   :  { %v246_v53 = vmax.f32 %v205_v52, 0.0 }
  0xbf   :  { %304 = vmatmul.f32.gmra.mxu1 %v246_v53 }
  0xc2   :  { %v207_v54 = vpop.f32.mrf.mxu0 }
  0xc3   :  { %v208_v55 = vadd.f32 %v707_v41, %v207_v54 }
  0xc5   :  { %v247_v56 = vmax.f32 %v208_v55, 0.0 }
  0xc7   :  { %307 = vmatmul.f32.gmra.mxu1 %v247_v56 }
  0xca   :  { %v210_v57 = vpop.f32.mrf.mxu0 }
  0xcb   :  { %v211_v58 = vadd.f32 %v707_v41, %v210_v57 }
  0xcd   :  { %v248_v59 = vmax.f32 %v211_v58, 0.0 }
  0xcf   :  { %310 = vmatmul.f32.gmra.mxu1 %v248_v59 }
  0xd2   :  { %v213_v60 = vpop.f32.mrf.mxu0 }
  0xd3   :  { %v214_v61 = vadd.f32 %v707_v41, %v213_v60 }
  0xd5   :  { %v249_v62 = vmax.f32 %v214_v61, 0.0 }
  0xd7   :  { %313 = vmatmul.f32.gmra.mxu1 %v249_v62 }
  0xda   :  { %v216_v63 = vpop.f32.mrf.mxu0 }
  0xdb   :  { %v217_v0 = vadd.f32 %v707_v41, %v216_v63 }
  0xdd   :  { %v250_v1 = vmax.f32 %v217_v0, 0.0 }
  0xdf   :  { %316 = vmatmul.f32.gmra.mxu1 %v250_v1 }
  0xe2   :  { %v219_v2 = vpop.f32.mrf.mxu0 }
  0xe3   :  { %v220_v3 = vadd.f32 %v707_v41, %v219_v2 }
  0xe5   :  { %v251_v4 = vmax.f32 %v220_v3, 0.0 }
  0xe7   :  { %319 = vmatmul.f32.gmra.mxu1 %v251_v4 }
  0xea   :  { %v222_v6 = vpop.f32.mrf.mxu0 }
  0xeb   :  { %v223_v7 = vadd.f32 %v707_v41, %v222_v6 }
  0xed   :  { %v252_v9 = vmax.f32 %v223_v7, 0.0 }
  0xef   :  { %322 = vmatmul.f32.gmra.mxu1 %v252_v9 }
  0xf2   :  { %v225_v13 = vpop.f32.mrf.mxu0 }
  0xf3   :  { %v226_v14 = vadd.f32 %v707_v41, %v225_v13 }
  0xf5   :  { %v253_v16 = vmax.f32 %v226_v14, 0.0 }
  0xf7   :  { %325 = vmatmul.f32.gmra.mxu1 %v253_v16 }
  0xfa   :  { %v228_v20 = vpop.f32.mrf.mxu0 }
  0xfb   :  { %v229_v21 = vadd.f32 %v707_v41, %v228_v20 }
  0xfd   :  { %v254_v23 = vmax.f32 %v229_v21, 0.0 }
  0xff   :  { %328 = vmatmul.f32.gmra.mxu1 %v254_v23 }
 0x102   :  { %v231_v27 = vpop.f32.mrf.mxu0 }
 0x103   :  { %v232_v28 = vadd.f32 %v707_v41, %v231_v27 }
 0x105   :  { %v255_v30 = vmax.f32 %v232_v28, 0.0 }
 0x107   :  { %331 = vmatmul.f32.gmra.mxu1 %v255_v30 }
 0x10a   :  { %v234_v33 = vpop.f32.mrf.mxu0 }
 0x10b   :  { %v235_v34 = vadd.f32 %v707_v41, %v234_v33 }
 0x10d   :  { %v256_v35 = vmax.f32 %v235_v34, 0.0 }
 0x10f   :  { %334 = vmatmul.f32.gmra.mxu1 %v256_v35 }
 0x112   :  { %v237_v36 = vpop.f32.mrf.mxu0 }
 0x113   :  { %v238_v37 = vadd.f32 %v707_v41, %v237_v36 }
 0x115   :  { %v257_v38 = vmax.f32 %v238_v37, 0.0 }
 0x117   :  { %337 = vmatmul.f32.gmra.mxu1 %v257_v38 }
 0x11a   :  { %v240_v39 = vpop.f32.mrf.mxu0 }
 0x11b   :  { %v241_v40 = vadd.f32 %v707_v41, %v240_v39 }
 0x11d   :  { %v258_v42 = vmax.f32 %v241_v40, 0.0 }
 0x11f   :  { %340 = vmatmul.f32.gmra.mxu1 %v258_v42 }
 0x124   :  { %v296_v44 = vpop.f32.mrf.mxu1 }
 0x125   :  { %v297_v45 = vadd.f32 %v516_v43, %v296_v44 }
 0x127   :  { %v344_v46 = vmax.f32 %v297_v45, 0.0 }
 0x129   :  { %396 = vmatmul.f32.vlgmr.msra.gmra.mxu2 %v344_v46 }
 0x12c   :  { %v299_v47 = vpop.f32.mrf.mxu1 }
 0x12d   :  { %v300_v48 = vadd.f32 %v516_v43, %v299_v47 }
 0x12f   :  { %v345_v49 = vmax.f32 %v300_v48, 0.0 }
 0x131   :  { %399 = vmatmul.f32.gmra.mxu2 %v345_v49 }
 0x134   :  { %v302_v50 = vpop.f32.mrf.mxu1 }
 0x135   :  { %v303_v51 = vadd.f32 %v516_v43, %v302_v50 }
 0x137   :  { %v346_v52 = vmax.f32 %v303_v51, 0.0 }
 0x139   :  { %402 = vmatmul.f32.gmra.mxu2 %v346_v52 }
 0x13c   :  { %v305_v53 = vpop.f32.mrf.mxu1 }
 0x13d   :  { %v306_v41 = vadd.f32 %v516_v43, %v305_v53 }
 0x13f   :  { %v347_v54 = vmax.f32 %v306_v41, 0.0 }
 0x141   :  { %405 = vmatmul.f32.gmra.mxu2 %v347_v54 }
 0x144   :  { %v308_v55 = vpop.f32.mrf.mxu1 }
 0x145   :  { %v309_v56 = vadd.f32 %v516_v43, %v308_v55 }
 0x147   :  { %v348_v57 = vmax.f32 %v309_v56, 0.0 }
 0x149   :  { %408 = vmatmul.f32.gmra.mxu2 %v348_v57 }
 0x14c   :  { %v311_v58 = vpop.f32.mrf.mxu1 }
 0x14d   :  { %v312_v59 = vadd.f32 %v516_v43, %v311_v58 }
 0x14f   :  { %v349_v60 = vmax.f32 %v312_v59, 0.0 }
 0x151   :  { %411 = vmatmul.f32.gmra.mxu2 %v349_v60 }
 0x154   :  { %v314_v61 = vpop.f32.mrf.mxu1 }
 0x155   :  { %v315_v62 = vadd.f32 %v516_v43, %v314_v61 }
 0x157   :  { %v350_v63 = vmax.f32 %v315_v62, 0.0 }
 0x159   :  { %414 = vmatmul.f32.gmra.mxu2 %v350_v63 }
 0x15c   :  { %v317_v0 = vpop.f32.mrf.mxu1 }
 0x15d   :  { %v318_v1 = vadd.f32 %v516_v43, %v317_v0 }
 0x15f   :  { %v351_v2 = vmax.f32 %v318_v1, 0.0 }
 0x161   :  { %417 = vmatmul.f32.gmra.mxu2 %v351_v2 }
 0x164   :  { %v320_v3 = vpop.f32.mrf.mxu1 }
 0x165   :  { %v321_v4 = vadd.f32 %v516_v43, %v320_v3 }
 0x167   :  { %v352_v5 = vmax.f32 %v321_v4, 0.0 }
 0x169   :  { %420 = vmatmul.f32.gmra.mxu2 %v352_v5 }
 0x16c   :  { %v323_v6 = vpop.f32.mrf.mxu1 }
 0x16d   :  { %v324_v7 = vadd.f32 %v516_v43, %v323_v6 }
 0x16f   :  { %v353_v8 = vmax.f32 %v324_v7, 0.0 }
 0x171   :  { %423 = vmatmul.f32.gmra.mxu2 %v353_v8 }
 0x174   :  { %v326_v9 = vpop.f32.mrf.mxu1 }
 0x175   :  { %v327_v10 = vadd.f32 %v516_v43, %v326_v9 }
 0x177   :  { %v354_v11 = vmax.f32 %v327_v10, 0.0 }
 0x179   :  { %426 = vmatmul.f32.gmra.mxu2 %v354_v11 }
 0x17c   :  { %v329_v12 = vpop.f32.mrf.mxu1 }
 0x17d   :  { %v330_v13 = vadd.f32 %v516_v43, %v329_v12  ;;  %v461_v12 = vld [vmem:[%s747_s7] sm:$0x1] }
 0x17f   :  { %v355_v14 = vmax.f32 %v330_v13, 0.0  ;;  %v463_v13 = vstv %s748_s8 }
 0x181   :  { %429 = vmatmul.f32.gmra.mxu2 %v355_v14 }
 0x184   :  { %v332_v15 = vpop.f32.mrf.mxu1 }
 0x185   :  { %v333_v16 = vadd.f32 %v516_v43, %v332_v15 }
 0x187   :  { %v356_v17 = vmax.f32 %v333_v16, 0.0 }
 0x189   :  { %432 = vmatmul.f32.gmra.mxu2 %v356_v17 }
 0x18c   :  { %v335_v18 = vpop.f32.mrf.mxu1 }
 0x18d   :  { %v336_v19 = vadd.f32 %v516_v43, %v335_v18 }
 0x18f   :  { %v357_v20 = vmax.f32 %v336_v19, 0.0 }
 0x191   :  { %435 = vmatmul.f32.gmra.mxu2 %v357_v20 }
 0x194   :  { %v338_v21 = vpop.f32.mrf.mxu1 }
 0x195   :  { %v339_v22 = vadd.f32 %v516_v43, %v338_v21 }
 0x197   :  { %v358_v23 = vmax.f32 %v339_v22, 0.0 }
 0x199   :  { %438 = vmatmul.f32.gmra.mxu2 %v358_v23 }
 0x19c   :  { %v341_v24 = vpop.f32.mrf.mxu1 }
 0x19d   :  { %v342_v25 = vadd.f32 %v516_v43, %v341_v24  ;;  %v517_v43 = vld [vmem:[%s746_s6] ss:$0 sm:$0xff] }
 0x19f   :  { %v359_v26 = vmax.f32 %v342_v25, 0.0 }
 0x1a1   :  { %441 = vmatmul.f32.gmra.mxu2 %v359_v26 }
 0x1ac   :  { %v397_v27 = vpop.f32.mrf.mxu2 }
 0x1ad   :  { %v398_v9 = vadd.f32 %v517_v43, %v397_v27 }
 0x1af   :  { %v445_v11 = vmax.f32 %v398_v9, 0.0 }
 0x1b4   :  { %v400_v28 = vpop.f32.mrf.mxu2 }
 0x1b5   :  { %v401_v7 = vadd.f32 %v517_v43, %v400_v28 }
 0x1b7   :  { %v446_v10 = vmax.f32 %v401_v7, 0.0 }
 0x1bc   :  { %v403_v29 = vpop.f32.mrf.mxu2 }
 0x1bd   :  { %v404_v5 = vadd.f32 %v517_v43, %v403_v29 }
 0x1bf   :  { %v447_v8 = vmax.f32 %v404_v5, 0.0 }
 0x1c4   :  { %v406_v30 = vpop.f32.mrf.mxu2 }
 0x1c5   :  { %v407_v3 = vadd.f32 %v517_v43, %v406_v30 }
 0x1c7   :  { %v448_v6 = vmax.f32 %v407_v3, 0.0 }
 0x1cc   :  { %v409_v31 = vpop.f32.mrf.mxu2 }
 0x1cd   :  { %v410_v1 = vadd.f32 %v517_v43, %v409_v31 }
 0x1cf   :  { %v449_v4 = vmax.f32 %v410_v1, 0.0 }
 0x1d4   :  { %v412_v32 = vpop.f32.mrf.mxu2 }
 0x1d5   :  { %v413_v63 = vadd.f32 %v517_v43, %v412_v32 }
 0x1d7   :  { %v450_v2 = vmax.f32 %v413_v63, 0.0 }
 0x1dc   :  { %v415_v33 = vpop.f32.mrf.mxu2 }
 0x1dd   :  { %v416_v61 = vadd.f32 %v517_v43, %v415_v33 }
 0x1df   :  { %v451_v0 = vmax.f32 %v416_v61, 0.0 }
 0x1e4   :  { %v418_v34 = vpop.f32.mrf.mxu2 }
 0x1e5   :  { %v419_v59 = vadd.f32 %v517_v43, %v418_v34 }
 0x1e7   :  { %v452_v62 = vmax.f32 %v419_v59, 0.0 }
 0x1ec   :  { %v421_v35 = vpop.f32.mrf.mxu2 }
 0x1ed   :  { %v422_v57 = vadd.f32 %v517_v43, %v421_v35 }
 0x1ef   :  { %v453_v60 = vmax.f32 %v422_v57, 0.0 }
 0x1f4   :  { %v424_v36 = vpop.f32.mrf.mxu2 }
 0x1f5   :  { %v425_v55 = vadd.f32 %v517_v43, %v424_v36 }
 0x1f7   :  { %v454_v58 = vmax.f32 %v425_v55, 0.0 }
 0x1fc   :  { %v427_v37 = vpop.f32.mrf.mxu2 }
 0x1fd   :  { %v428_v41 = vadd.f32 %v517_v43, %v427_v37 }
 0x1ff   :  { %v455_v56 = vmax.f32 %v428_v41, 0.0 }
 0x204   :  { %v430_v38 = vpop.f32.mrf.mxu2 }
 0x205   :  { %v431_v52 = vadd.f32 %v517_v43, %v430_v38 }
 0x207   :  { %v456_v54 = vmax.f32 %v431_v52, 0.0 }
 0x20c   :  { %v433_v39 = vpop.f32.mrf.mxu2 }
 0x20d   :  { %v434_v50 = vadd.f32 %v517_v43, %v433_v39 }
 0x20f   :  { %v457_v53 = vmax.f32 %v434_v50, 0.0 }
 0x214   :  { %v436_v40 = vpop.f32.mrf.mxu2 }
 0x215   :  { %v437_v48 = vadd.f32 %v517_v43, %v436_v40 }
 0x217   :  { %v458_v51 = vmax.f32 %v437_v48, 0.0 }
 0x21c   :  { %v439_v42 = vpop.f32.mrf.mxu2 }
 0x21d   :  { %v440_v46 = vadd.f32 %v517_v43, %v439_v42 }
 0x21f   :  { %v459_v49 = vmax.f32 %v440_v46, 0.0 }
 0x224   :  { %v442_v44 = vpop.f32.mrf.mxu2 }
 0x225   :  { %v443_v45 = vadd.f32 %v517_v43, %v442_v44 }
 0x227   :  { %v460_v47 = vmax.f32 %v443_v45, 0.0 }
 0x229   :  { %464 = vmatpush.xpose.msra.mxu3 %v460_v47 }
 0x22d   :  { %465 = vmatpush.xpose.msra.mxu3 %v459_v49 }
 0x231   :  { %466 = vmatpush.xpose.msra.mxu3 %v458_v51 }
 0x235   :  { %467 = vmatpush.xpose.msra.mxu3 %v457_v53 }
 0x239   :  { %468 = vmatpush.xpose.msra.mxu3 %v456_v54 }
 0x23d   :  { %469 = vmatpush.xpose.msra.mxu3 %v455_v56 }
 0x241   :  { %470 = vmatpush.xpose.msra.mxu3 %v454_v58 }
 0x245   :  { %471 = vmatpush.xpose.msra.mxu3 %v453_v60 }
 0x249   :  { %472 = vmatpush.xpose.msra.mxu3 %v452_v62 }
 0x24d   :  { %473 = vmatpush.xpose.msra.mxu3 %v451_v0 }
 0x251   :  { %474 = vmatpush.xpose.msra.mxu3 %v450_v2 }
 0x255   :  { %475 = vmatpush.xpose.msra.mxu3 %v449_v4 }
 0x259   :  { %476 = vmatpush.xpose.msra.mxu3 %v448_v6 }
 0x25d   :  { %477 = vmatpush.xpose.msra.mxu3 %v447_v8 }
 0x261   :  { %478 = vmatpush.xpose.msra.mxu3 %v446_v10 }
 0x265   :  { %479 = vmatpush.xpose.msra.mxu3 %v445_v11 }
 0x268   :  { %480 = vmatmul.f32.vlgmr.msra.gmra.mxu3 %v461_v12 }
 0x2eb   :  { %v481_v14 = vpop.f32.mrf.mxu3 }
 0x2ec   :  { %v482_v15 = vadd.f32 %v481_v14, %v463_v13 }
 0x2ee   :  { %484 = vst [vmem:[%s749_s9] sm:$0x1] %v482_v15 }
 0x2ef   :  { %489 = vsyncpa [#allocation4], 1 }
 0x2f0   :  { %490 = vsyncpa [#allocation6], 1 }
 0x2f1   :  { %491 = vsyncpa [#allocation9], 1 }

</bundles_post_ra>
